<compile_context>
chip_gen: v6e
topology: v6e:2x2x1
jax: 0.10.0
libtpu: 0.0.40
codegen_flags: <defaults>
</compile_context>

<pallas_src>
import functools

import numpy as np
import jax
import jax.numpy as jnp
from jax.experimental import pallas as pl
from jax.experimental.pallas import tpu as pltpu


# ----------------------------------------------------------------------------
# Fused Pallas kernel: all tiers + output_ff in one VMEM-resident body
# ----------------------------------------------------------------------------
def _make_fused_kernel(num_tiers):
    """Kernel body over refs laid out as:
       z, (K_i, W_i, b_i) * num_tiers, ff_w1, ff_b1, ff_w2, ff_b2, out
    Per tier: x <- relu( (K @ x) @ W + b )
    Then:     out <- relu(x @ ff_w1 + ff_b1) @ ff_w2 + ff_b2
    """

    def kernel(*refs):
        idx = 0
        x = refs[idx][...]
        idx += 1
        for _ in range(num_tiers):
            k = refs[idx][...]
            w = refs[idx + 1][...]
            b = refs[idx + 2][...]
            idx += 3
            # Resample along time: (L_out, L_in) @ (L_in, D_in) -> (L_out, D_in)
            xr = jnp.dot(k, x, preferred_element_type=jnp.float32)
            # Project channels + ReLU: (L_out, D_in) @ (D_in, D_out)
            x = jnp.maximum(
                jnp.dot(xr, w, preferred_element_type=jnp.float32) + b, 0.0
            )
        fw1 = refs[idx][...]
        fb1 = refs[idx + 1][...]
        fw2 = refs[idx + 2][...]
        fb2 = refs[idx + 3][...]
        o_ref = refs[idx + 4]
        h = jnp.maximum(
            jnp.dot(x, fw1, preferred_element_type=jnp.float32) + fb1, 0.0
        )
        o_ref[...] = jnp.dot(h, fw2, preferred_element_type=jnp.float32) + fb2

    return kernel


def fused_forward(z, kmats, tier_ws, tier_bs, ff_w1, ff_b1, ff_w2, ff_b2, *,
                  num_tiers):
    args = [z]
    for i in range(num_tiers):
        args += [kmats[i], tier_ws[i], tier_bs[i]]
    args += [ff_w1, ff_b1, ff_w2, ff_b2]

    l_out = kmats[-1].shape[0]
    d_out = ff_w2.shape[1]
    vmem = pl.BlockSpec(memory_space=pltpu.MemorySpace.VMEM)
    return pl.pallas_call(
        _make_fused_kernel(num_tiers),
        out_shape=jax.ShapeDtypeStruct((l_out, d_out), jnp.float32),
        in_specs=[vmem] * len(args),
        out_specs=vmem,
    )(*args)


# ----------------------------------------------------------------------------
# Host-side glue: gaussian resampling matrices (numpy, cached) and parameters
# ----------------------------------------------------------------------------
@functools.lru_cache(maxsize=None)
def gaussian_resample_matrix(l_in, l_out, sigma=0.1):
    """Row-normalized gaussian kernel mapping an L_in grid onto an L_out grid.

    Computed with numpy once per (l_in, l_out) and baked in as a constant
    operand of the fused kernel -- no per-call tracing cost.
    """
    t_out = np.linspace(0.0, 1.0, l_out, dtype=np.float64)
    t_in = np.linspace(0.0, 1.0, l_in, dtype=np.float64)
    d = t_out[:, None] - t_in[None, :]
    w = np.exp(-0.5 * np.square(d / sigma))
    w = w / np.sum(w, axis=1, keepdims=True)
    return jnp.asarray(w, dtype=jnp.float32)


class HierarchicalModelPallas:
    def __init__(self, latent_dims, tier_lengths, num_tiers=3, key=None):
        assert len(latent_dims) == num_tiers + 1
        assert len(tier_lengths) == num_tiers - 1
        self.latent_dims = latent_dims
        self.tier_lengths = tier_lengths
        self.num_tiers = num_tiers

        key = jax.random.PRNGKey(0) if key is None else key
        keys = jax.random.split(key, num_tiers + 2)

        # Per-tier Linear(d_in, d_out) parameters.
        self.tier_w = []
        self.tier_b = []
        for i in range(num_tiers):
            d_in, d_out = latent_dims[i], latent_dims[i + 1]
            scale = 1.0 / jnp.sqrt(jnp.float32(d_in))
            w = jax.random.normal(keys[i], (d_in, d_out), jnp.float32) * scale
            b = jnp.zeros((1, d_out), jnp.float32)
            self.tier_w.append(w)
            self.tier_b.append(b)

        # output_ff: Linear(d, 4d) -> ReLU -> Linear(4d, 128)
        d = latent_dims[-1]
        self.ff_w1 = jax.random.normal(keys[-2], (d, 4 * d), jnp.float32) / jnp.sqrt(
            jnp.float32(d)
        )
        self.ff_b1 = jnp.zeros((1, 4 * d), jnp.float32)
        self.ff_w2 = jax.random.normal(keys[-1], (4 * d, 128), jnp.float32) / jnp.sqrt(
            jnp.float32(4 * d)
        )
        self.ff_b2 = jnp.zeros((1, 128), jnp.float32)

        # One fused, jitted forward; specializes (and caches) per input shape.
        self._forward = jax.jit(
            functools.partial(fused_forward, num_tiers=self.num_tiers),
            static_argnames=("num_tiers",),
        )

    def __call__(self, z, length):
        # z: (L0, D0). PyTorch's z.unsqueeze(0) batch-of-1 is carried as glue
        # and re-inserted at the end to mirror `.transpose(0, 1)`.
        z = jnp.asarray(z, jnp.float32)

        # Precompute the static resampling matrices for this (L0, ..., length).
        kmats = []
        l_in = z.shape[0]
        for i in range(self.num_tiers):
            tgt = self.tier_lengths[i] if i < self.num_tiers - 1 else length
            kmats.append(gaussian_resample_matrix(int(l_in), int(tgt)))
            l_in = tgt

        y = self._forward(
            z, tuple(kmats), tuple(self.tier_w), tuple(self.tier_b),
            self.ff_w1, self.ff_b1, self.ff_w2, self.ff_b2,
        )
        # (1, L, 128).transpose(0, 1) -> (L, 1, 128)
        return y[:, None, :]


# ----------------------------------------------------------------------------
# Main
# ----------------------------------------------------------------------------
if __name__ == "__main__":
    latent_dims = (16, 32, 32, 32)   # len == num_tiers + 1
    tier_lengths = (6, 8)            # len == num_tiers - 1
    num_tiers = 3
    final_length = 8

    key = jax.random.PRNGKey(0)
    kz, kp = jax.random.split(key)
    z = jax.random.normal(kz, (4, latent_dims[0]), jnp.float32)

    model = HierarchicalModelPallas(latent_dims, tier_lengths, num_tiers, key=kp)

    out = model(z, final_length)
    out = jax.block_until_ready(out)

    assert out.shape == (final_length, 1, 128), out.shape
    assert jnp.all(jnp.isfinite(out))
    print("KERNEL_OK")
</pallas_src>

<mosaic_0001>
module attributes {stable_mosaic.version = 11 : i64} {
  func.func @kernel(%arg0: memref<4x16xf32, #tpu.memory_space<vmem>>, %arg1: memref<6x4xf32, #tpu.memory_space<vmem>>, %arg2: memref<16x32xf32, #tpu.memory_space<vmem>>, %arg3: memref<1x32xf32, #tpu.memory_space<vmem>>, %arg4: memref<8x6xf32, #tpu.memory_space<vmem>>, %arg5: memref<32x32xf32, #tpu.memory_space<vmem>>, %arg6: memref<1x32xf32, #tpu.memory_space<vmem>>, %arg7: memref<8x8xf32, #tpu.memory_space<vmem>>, %arg8: memref<32x32xf32, #tpu.memory_space<vmem>>, %arg9: memref<1x32xf32, #tpu.memory_space<vmem>>, %arg10: memref<32x128xf32, #tpu.memory_space<vmem>>, %arg11: memref<1x128xf32, #tpu.memory_space<vmem>>, %arg12: memref<128x128xf32, #tpu.memory_space<vmem>>, %arg13: memref<1x128xf32, #tpu.memory_space<vmem>>, %arg14: memref<8x128xf32, #tpu.memory_space<vmem>>) attributes {dimension_semantics = [], scalar_prefetch = 0 : i64, scratch_operands = 0 : i64, tpu.core_type = #tpu.core_type<tc>} {
    %c0 = arith.constant 0 : index
    %c0_0 = arith.constant 0 : index
    %0 = vector.load %arg0[%c0, %c0_0] : memref<4x16xf32, #tpu.memory_space<vmem>>, vector<4x16xf32>
    %c0_1 = arith.constant 0 : index
    %c0_2 = arith.constant 0 : index
    %1 = vector.load %arg1[%c0_1, %c0_2] : memref<6x4xf32, #tpu.memory_space<vmem>>, vector<6x4xf32>
    %c0_3 = arith.constant 0 : index
    %c0_4 = arith.constant 0 : index
    %2 = vector.load %arg2[%c0_3, %c0_4] : memref<16x32xf32, #tpu.memory_space<vmem>>, vector<16x32xf32>
    %c0_5 = arith.constant 0 : index
    %c0_6 = arith.constant 0 : index
    %3 = vector.load %arg3[%c0_5, %c0_6] : memref<1x32xf32, #tpu.memory_space<vmem>>, vector<1x32xf32>
    %cst = arith.constant dense<0.000000e+00> : vector<6x16xf32>
    %4 = tpu.matmul %1, %0, %cst {dimension_numbers = #tpu.dot_dimension_numbers<[1], [0], [0], [1], [0, 0, 1, 1], [], []>} : vector<6x4xf32>, vector<4x16xf32>, vector<6x16xf32> -> vector<6x16xf32>
    %cst_7 = arith.constant dense<0.000000e+00> : vector<6x32xf32>
    %5 = tpu.matmul %4, %2, %cst_7 {dimension_numbers = #tpu.dot_dimension_numbers<[1], [0], [0], [1], [0, 0, 1, 1], [], []>} : vector<6x16xf32>, vector<16x32xf32>, vector<6x32xf32> -> vector<6x32xf32>
    %6 = vector.broadcast %3 : vector<1x32xf32> to vector<6x32xf32>
    %7 = arith.addf %5, %6 : vector<6x32xf32>
    %cst_8 = arith.constant 0.000000e+00 : f32
    %8 = vector.broadcast %cst_8 : f32 to vector<6x32xf32>
    %9 = arith.maximumf %7, %8 : vector<6x32xf32>
    %c0_9 = arith.constant 0 : index
    %c0_10 = arith.constant 0 : index
    %10 = vector.load %arg4[%c0_9, %c0_10] : memref<8x6xf32, #tpu.memory_space<vmem>>, vector<8x6xf32>
    %c0_11 = arith.constant 0 : index
    %c0_12 = arith.constant 0 : index
    %11 = vector.load %arg5[%c0_11, %c0_12] : memref<32x32xf32, #tpu.memory_space<vmem>>, vector<32x32xf32>
    %c0_13 = arith.constant 0 : index
    %c0_14 = arith.constant 0 : index
    %12 = vector.load %arg6[%c0_13, %c0_14] : memref<1x32xf32, #tpu.memory_space<vmem>>, vector<1x32xf32>
    %cst_15 = arith.constant dense<0.000000e+00> : vector<8x32xf32>
    %13 = tpu.matmul %10, %9, %cst_15 {dimension_numbers = #tpu.dot_dimension_numbers<[1], [0], [0], [1], [0, 0, 1, 1], [], []>} : vector<8x6xf32>, vector<6x32xf32>, vector<8x32xf32> -> vector<8x32xf32>
    %cst_16 = arith.constant dense<0.000000e+00> : vector<8x32xf32>
    %14 = tpu.matmul %13, %11, %cst_16 {dimension_numbers = #tpu.dot_dimension_numbers<[1], [0], [0], [1], [0, 0, 1, 1], [], []>} : vector<8x32xf32>, vector<32x32xf32>, vector<8x32xf32> -> vector<8x32xf32>
    %15 = vector.broadcast %12 : vector<1x32xf32> to vector<8x32xf32>
    %16 = arith.addf %14, %15 : vector<8x32xf32>
    %cst_17 = arith.constant 0.000000e+00 : f32
    %17 = vector.broadcast %cst_17 : f32 to vector<8x32xf32>
    %18 = arith.maximumf %16, %17 : vector<8x32xf32>
    %c0_18 = arith.constant 0 : index
    %c0_19 = arith.constant 0 : index
    %19 = vector.load %arg7[%c0_18, %c0_19] : memref<8x8xf32, #tpu.memory_space<vmem>>, vector<8x8xf32>
    %c0_20 = arith.constant 0 : index
    %c0_21 = arith.constant 0 : index
    %20 = vector.load %arg8[%c0_20, %c0_21] : memref<32x32xf32, #tpu.memory_space<vmem>>, vector<32x32xf32>
    %c0_22 = arith.constant 0 : index
    %c0_23 = arith.constant 0 : index
    %21 = vector.load %arg9[%c0_22, %c0_23] : memref<1x32xf32, #tpu.memory_space<vmem>>, vector<1x32xf32>
    %cst_24 = arith.constant dense<0.000000e+00> : vector<8x32xf32>
    %22 = tpu.matmul %19, %18, %cst_24 {dimension_numbers = #tpu.dot_dimension_numbers<[1], [0], [0], [1], [0, 0, 1, 1], [], []>} : vector<8x8xf32>, vector<8x32xf32>, vector<8x32xf32> -> vector<8x32xf32>
    %cst_25 = arith.constant dense<0.000000e+00> : vector<8x32xf32>
    %23 = tpu.matmul %22, %20, %cst_25 {dimension_numbers = #tpu.dot_dimension_numbers<[1], [0], [0], [1], [0, 0, 1, 1], [], []>} : vector<8x32xf32>, vector<32x32xf32>, vector<8x32xf32> -> vector<8x32xf32>
    %24 = vector.broadcast %21 : vector<1x32xf32> to vector<8x32xf32>
    %25 = arith.addf %23, %24 : vector<8x32xf32>
    %cst_26 = arith.constant 0.000000e+00 : f32
    %26 = vector.broadcast %cst_26 : f32 to vector<8x32xf32>
    %27 = arith.maximumf %25, %26 : vector<8x32xf32>
    %c0_27 = arith.constant 0 : index
    %c0_28 = arith.constant 0 : index
    %28 = vector.load %arg10[%c0_27, %c0_28] : memref<32x128xf32, #tpu.memory_space<vmem>>, vector<32x128xf32>
    %c0_29 = arith.constant 0 : index
    %c0_30 = arith.constant 0 : index
    %29 = vector.load %arg11[%c0_29, %c0_30] : memref<1x128xf32, #tpu.memory_space<vmem>>, vector<1x128xf32>
    %c0_31 = arith.constant 0 : index
    %c0_32 = arith.constant 0 : index
    %30 = vector.load %arg12[%c0_31, %c0_32] : memref<128x128xf32, #tpu.memory_space<vmem>>, vector<128x128xf32>
    %c0_33 = arith.constant 0 : index
    %c0_34 = arith.constant 0 : index
    %31 = vector.load %arg13[%c0_33, %c0_34] : memref<1x128xf32, #tpu.memory_space<vmem>>, vector<1x128xf32>
    %cst_35 = arith.constant dense<0.000000e+00> : vector<8x128xf32>
    %32 = tpu.matmul %27, %28, %cst_35 {dimension_numbers = #tpu.dot_dimension_numbers<[1], [0], [0], [1], [0, 0, 1, 1], [], []>} : vector<8x32xf32>, vector<32x128xf32>, vector<8x128xf32> -> vector<8x128xf32>
    %33 = vector.broadcast %29 : vector<1x128xf32> to vector<8x128xf32>
    %34 = arith.addf %32, %33 : vector<8x128xf32>
    %cst_36 = arith.constant 0.000000e+00 : f32
    %35 = vector.broadcast %cst_36 : f32 to vector<8x128xf32>
    %36 = arith.maximumf %34, %35 : vector<8x128xf32>
    %cst_37 = arith.constant dense<0.000000e+00> : vector<8x128xf32>
    %37 = tpu.matmul %36, %30, %cst_37 {dimension_numbers = #tpu.dot_dimension_numbers<[1], [0], [0], [1], [0, 0, 1, 1], [], []>} : vector<8x128xf32>, vector<128x128xf32>, vector<8x128xf32> -> vector<8x128xf32>
    %38 = vector.broadcast %31 : vector<1x128xf32> to vector<8x128xf32>
    %39 = arith.addf %37, %38 : vector<8x128xf32>
    %c0_38 = arith.constant 0 : index
    %c0_39 = arith.constant 0 : index
    %40 = vector.load %arg14[%c0_38, %c0_39] : memref<8x128xf32, #tpu.memory_space<vmem>>, vector<8x128xf32>
    tpu.vector_store %arg14[%c0_38, %c0_39], %39 {strides = array<i32>} : memref<8x128xf32, #tpu.memory_space<vmem>>, vector<8x128xf32>,
    return
  }
}

</mosaic_0001>

<bundles_post_ra>
// kernel: fused_forward.1
= control target key start
LH: loop header
LB: loop body
LE: loop exit
PB: predicated region body
PF: predicated region fallthrough
CT: control target
= control target key end

     0   :  { %19 = vsyncpa [#allocation3], 0  ;;  %s1349_s0 = inlined_call_operand.hbm [shape: f32[4,16], index: 0, kind: input, shape index: {}]   ;;  %s1350_s1 = inlined_call_operand.vmem [shape: f32[6,4], index: 1, kind: input, shape index: {}]   ;;  %s1351_s2 = inlined_call_operand.vmem [shape: f32[16,32], index: 2, kind: input, shape index: {}]   ;;  %s1352_s3 = inlined_call_operand.vmem [shape: f32[1,32], index: 3, kind: input, shape index: {}]   ;;  %s1353_s4 = inlined_call_operand.hbm [shape: f32[8,6], index: 4, kind: input, shape index: {}]   ;;  %s1354_s5 = inlined_call_operand.hbm [shape: f32[32,32], index: 5, kind: input, shape index: {}]   ;;  %s1355_s6 = inlined_call_operand.vmem [shape: f32[1,32], index: 6, kind: input, shape index: {}]   ;;  %s1356_s7 = inlined_call_operand.hbm [shape: f32[8,8], index: 7, kind: input, shape index: {}]   ;;  %s1357_s8 = inlined_call_operand.hbm [shape: f32[32,32], index: 8, kind: input, shape index: {}]   ;;  %s1358_s9 = inlined_call_operand.vmem [shape: f32[1,32], index: 9, kind: input, shape index: {}]   ;;  %s1359_s10 = inlined_call_operand.hbm [shape: f32[32,128], index: 10, kind: input, shape index: {}]   ;;  %s1360_s11 = inlined_call_operand.vmem [shape: f32[1,128], index: 11, kind: input, shape index: {}]   ;;  %s1361_s12 = inlined_call_operand.hbm [shape: f32[128,128], index: 12, kind: input, shape index: {}]   ;;  %s1362_s13 = inlined_call_operand.vmem [shape: f32[1,128], index: 13, kind: input, shape index: {}]   ;;  %s1363_s14 = inlined_call_operand.hbm [shape: f32[8,128], index: 14, kind: output, shape index: {}]  }
   0x1   :  { %20 = vsyncpa [#allocation6], 0 }
   0x2   :  { %21 = vsyncpa [#allocation9], 0 }
   0x3   :  { %22 = vsyncpa [#allocation12], 0 }
   0x4   :  { %23 = vsyncpa [#allocation4], 0  ;;  %s1150_s29 = smov [#allocation5]   ;;  %s1151_s15 = smov [#allocation8]  }
   0x5   :  { %s46_s30 = sshll.u32 %s1150_s29, 4  ;;  %s70_s16 = sshll.u32 %s1151_s15, 4  ;;  %s47_s30 = int_to_ptr.vmem [resolvable:$true] %s46_s30  ;;  %s71_s16 = int_to_ptr.vmem [resolvable:$true] %s70_s16 }
   0x6   :  { %s988_s17 = scalar_lea.vmem %s47_s30, 128  ;;  %p993_p1 = scmp.lt.s32.totalorder %s47_s30, %s47_s30 }
   0x7   :  { %p989_p0 = scmp.ne.s32.totalorder %s47_s30, %s988_s17  ;;  %p994_p2 = scmp.lt.s32.totalorder %s988_s17, %s988_s17 }
   0x9   :  { %p995_p3 = por %p994_p2, %p993_p1 }
   0xb   :  { %p996_p4 = pnand %p995_p3, %p989_p0 }
   0xd   :  { %999 = shalt.err (!%p996_p4)
}
   0xe   :  { %49 = dma.hbm_to_vmem [thread:$0]  %s1353_s4, 128, %s47_s30, [#allocation6]  }
   0xf   :  { %s1008_s20 = scalar_lea.vmem %s71_s16, 128  ;;  %p1013_p6 = scmp.lt.s32.totalorder %s71_s16, %s71_s16 }
  0x10   :  { %p1009_p5 = scmp.ne.s32.totalorder %s71_s16, %s1008_s20  ;;  %p1014_p7 = scmp.lt.s32.totalorder %s1008_s20, %s1008_s20 }
  0x12   :  { %p1015_p8 = por %p1014_p7, %p1013_p6 }
  0x14   :  { %p1016_p9 = pnand %p1015_p8, %p1009_p5 }
  0x16   :  { %1019 = shalt.err (!%p1016_p9)
}
  0x17   :  { %73 = dma.hbm_to_vmem [thread:$0]  %s1356_s7, 128, %s71_s16, [#allocation9]  }
  0x18   :  { %s1152_s23 = smov [#allocation11]   ;;  %s1153_s25 = smov [#allocation2]  }
  0x19   :  { %s93_s24 = sshll.u32 %s1152_s23, 4  ;;  %s30_s26 = sshll.u32 %s1153_s25, 4  ;;  %s94_s24 = int_to_ptr.vmem [resolvable:$true] %s93_s24  ;;  %s31_s26 = int_to_ptr.vmem [resolvable:$true] %s30_s26 }
  0x1a   :  { %s1028_s27 = scalar_lea.vmem %s94_s24, 512  ;;  %p1033_p11 = scmp.lt.s32.totalorder %s94_s24, %s94_s24 }
  0x1b   :  { %p1029_p10 = scmp.ne.s32.totalorder %s94_s24, %s1028_s27  ;;  %p1034_p12 = scmp.lt.s32.totalorder %s1028_s27, %s1028_s27 }
  0x1d   :  { %p1035_p13 = por %p1034_p12, %p1033_p11 }
  0x1f   :  { %p1036_p0 = pnand %p1035_p13, %p1029_p10 }
  0x21   :  { %1039 = shalt.err (!%p1036_p0)
}
  0x22   :  { %s1154_s4 = smov 128   ;;  %s1155_s28 = smov 8  }
  0x23   :  { %99 = dma.hbm_to_vmem [thread:$0]  %s1359_s10, 512, %s94_s24, [#allocation12], %s1154_s4, %s1154_s4, %s1155_s28  }
  0x24   :  { %s1048_s30 = scalar_lea.vmem %s31_s26, 64  ;;  %p1053_p2 = scmp.lt.s32.totalorder %s31_s26, %s31_s26 }
  0x25   :  { %p1049_p1 = scmp.ne.s32.totalorder %s31_s26, %s1048_s30  ;;  %p1054_p3 = scmp.lt.s32.totalorder %s1048_s30, %s1048_s30 }
  0x27   :  { %p1055_p4 = por %p1054_p3, %p1053_p2 }
  0x29   :  { %p1056_p5 = pnand %p1055_p4, %p1049_p1 }
  0x2b   :  { %1059 = shalt.err (!%p1056_p5)
}
  0x2c   :  { %33 = dma.hbm_to_vmem [thread:$0]  %s1349_s0, 64, %s31_s26, [#allocation3]  }
  0x2d   :  { %s1156_s17 = smov [#allocation7]   ;;  %s1157_s19 = smov [#allocation10]  }
  0x2e   :  { %s55_s18 = sshll.u32 %s1156_s17, 4  ;;  %s79_s20 = sshll.u32 %s1157_s19, 4  ;;  %s56_s18 = int_to_ptr.vmem [resolvable:$true] %s55_s18  ;;  %s80_s20 = int_to_ptr.vmem [resolvable:$true] %s79_s20 }
  0x2f   :  { %s1068_s21 = scalar_lea.vmem %s56_s18, 512  ;;  %p1073_p7 = scmp.lt.s32.totalorder %s56_s18, %s56_s18 }
  0x30   :  { %p1069_p6 = scmp.ne.s32.totalorder %s56_s18, %s1068_s21  ;;  %p1074_p8 = scmp.lt.s32.totalorder %s1068_s21, %s1068_s21 }
  0x32   :  { %p1075_p9 = por %p1074_p8, %p1073_p7 }
  0x34   :  { %p1076_p10 = pnand %p1075_p9, %p1069_p6 }
  0x36   :  { %1079 = shalt.err (!%p1076_p10)
}
  0x37   :  { %61 = dma.hbm_to_vmem [thread:$0]  %s1354_s5, 512, %s56_s18, [#allocation6], %s1154_s4, %s1154_s4, %s1155_s28  }
  0x38   :  { %s1088_s0 = scalar_lea.vmem %s80_s20, 512  ;;  %p1093_p12 = scmp.lt.s32.totalorder %s80_s20, %s80_s20 }
  0x39   :  { %p1089_p11 = scmp.ne.s32.totalorder %s80_s20, %s1088_s0  ;;  %p1094_p13 = scmp.lt.s32.totalorder %s1088_s0, %s1088_s0 }
  0x3b   :  { %p1095_p0 = por %p1094_p13, %p1093_p12 }
  0x3d   :  { %p1096_p1 = pnand %p1095_p0, %p1089_p11 }
  0x3f   :  { %1099 = shalt.err (!%p1096_p1)
}
  0x40   :  { %85 = dma.hbm_to_vmem [thread:$0]  %s1357_s8, 512, %s80_s20, [#allocation9], %s1154_s4, %s1154_s4, %s1155_s28  }
  0x41   :  { %s1158_s25 = smov [#allocation13]  }
  0x42   :  { %s107_s26 = sshll.u32 %s1158_s25, 4  ;;  %s108_s26 = int_to_ptr.vmem [resolvable:$true] %s107_s26 }
  0x43   :  { %s1108_s27 = scalar_lea.vmem %s108_s26, 2048  ;;  %p1113_p3 = scmp.lt.s32.totalorder %s108_s26, %s108_s26 }
  0x44   :  { %p1109_p2 = scmp.ne.s32.totalorder %s108_s26, %s1108_s27  ;;  %p1114_p4 = scmp.lt.s32.totalorder %s1108_s27, %s1108_s27 }
  0x46   :  { %p1115_p5 = por %p1114_p4, %p1113_p3 }
  0x48   :  { %p1116_p6 = pnand %p1115_p5, %p1109_p2 }
  0x4a   :  { %1119 = shalt.err (!%p1116_p6)
}
  0x4b   :  { %113 = dma.hbm_to_vmem [thread:$0]  %s1361_s12, 2048, %s108_s26, [#allocation12], %s1154_s4, %s1154_s4, %s1155_s28  }
  0x4c   :  { %1140 = dma.done.wait [#allocation3], 64  }
  0x4d   :  { %1141 = vsyncadd [#allocation3], 4294967232 }
  0x4e   :  { %1142 = dma.done.wait [#allocation6], 640  }
  0x4f   :  { %1143 = vsyncadd [#allocation6], 4294966656 }
  0x50   :  { %1144 = dma.done.wait [#allocation9], 640  }
  0x51   :  { %1145 = vsyncadd [#allocation9], 4294966656 }
  0x52   :  { %1146 = dma.done.wait [#allocation12], 2560  }
  0x53   :  { %1147 = vsyncadd [#allocation12], 4294964736  ;;  %v1159_v0 = vmov 0.0   ;;  %vm1160_vm0 = vmmov 0   ;;  %vm146_vm1 = vcmask 1043456   ;;  %vm142_vm2 = vcmask 31744  }
  0x54   :  { %878 = vmatprep.subr.mxu1 %v1159_v0  ;;  %880 = vmatprep.mubr.msk.f32.mxu1 %vm1160_vm0, %v1159_v0  ;;  %v137_v1 = vld [vmem:[#allocation2] sm:$0xf]  ;;  %v140_v3 = vld [vmem:[%s1351_s2 + $0x8] sm:$0xff]  ;;  %vm226_vm3 = vcmask 130048   ;;  %vm311_vm4 = vcmask 1045504   ;;  %vm307_vm5 = vcmask 48128  }
  0x55   :  { %906 = vmatprep.subr.mxu0 %v1159_v0  ;;  %908 = vmatprep.mubr.msk.f32.mxu0 %vm1160_vm0, %v1159_v0  ;;  %v138_v2 = vld [vmem:[%s1350_s1] sm:$0x3f]  ;;  %v303_v15 = vld [vmem:[#allocation7 + $0x8] sm:$0xff]  ;;  %v302_v16 = vld [vmem:[#allocation7] sm:$0xff]  ;;  %vm391_vm6 = vcmask 261120   ;;  %vm472_vm7 = vcmask 64512  }
  0x56   :  { %879 = vmatpush3.msk.msra.mxu1 %vm146_vm1, %v137_v1  ;;  %v139_v4 = vld [vmem:[%s1351_s2] sm:$0xff]  ;;  %v470_v19 = vld [vmem:[#allocation10 + $0x18] sm:$0xff]  ;;  %v467_v28 = vld [vmem:[#allocation10] sm:$0xff]  ;;  %s1161_s20 = smov [#allocation14]  }
  0x57   :  { %881 = vmatmul.mubr.msk.f32.vlgmr.msra.gmra.mxu1 %vm142_vm2, %v138_v2  ;;  %883 = vmatprep.subr.mxu1 %v1159_v0  ;;  %v825_v7 = vld [vmem:[%s1352_s3] ss:$0 sm:$0xff]  ;;  %v301_v12 = vld [vmem:[#allocation5] sm:$0xff]  ;;  %v466_v27 = vld [vmem:[#allocation8] sm:$0xff]  ;;  %s811_s21 = sshll.u32 %s1161_s20, 4  ;;  %s812_s21 = int_to_ptr.vmem [resolvable:$true] %s811_s21 }
  0x58   :  { %884 = vmatpush3.msra.mxu1 %v140_v3  ;;  %887 = vmatprep.mubr.msk.f32.mxu1 %vm1160_vm0, %v1159_v0  ;;  %v305_v13 = vld [vmem:[#allocation7 + $0x18] sm:$0xff]  ;;  %v304_v14 = vld [vmem:[#allocation7 + $0x10] sm:$0xff]  ;;  %v629_v29 = vld [vmem:[#allocation11 + $0x18] sm:$0xff]  ;;  %s1120_s10 = scalar_lea.vmem %s812_s21, 128  ;;  %p1125_p8 = scmp.lt.s32.totalorder %s812_s21, %s812_s21 }
  0x59   :  { %885 = vmatprep.subr.mxu1 %v1159_v0  ;;  %v469_v20 = vld [vmem:[#allocation10 + $0x10] sm:$0xff]  ;;  %v468_v21 = vld [vmem:[#allocation10 + $0x8] sm:$0xff]  ;;  %v626_v34 = vld [vmem:[#allocation11] sm:$0xff]  ;;  %p1121_p7 = scmp.ne.s32.totalorder %s812_s21, %s1120_s10  ;;  %p1126_p9 = scmp.lt.s32.totalorder %s1120_s10, %s1120_s10 }
  0x5a   :  { %886 = vmatpush3.msra.mxu1 %v139_v4  ;;  %v829_v22 = vld [vmem:[%s1355_s6] ss:$0 sm:$0xff]  ;;  %v628_v32 = vld [vmem:[#allocation11 + $0x10] sm:$0xff]  ;;  %v646_v35 = vld [vmem:[#allocation13 + $0x78] sm:$0xff] }
  0x5b   :  { %890 = vmatprep.subr.mxu1 %v1159_v0  ;;  %v627_v33 = vld [vmem:[#allocation11 + $0x8] sm:$0xff]  ;;  %v645_v36 = vld [vmem:[#allocation13 + $0x70] sm:$0xff]  ;;  %v643_v38 = vld [vmem:[#allocation13 + $0x60] sm:$0xff]  ;;  %p1127_p10 = por %p1126_p9, %p1125_p8 }
  0x5c   :  { %v644_v37 = vld [vmem:[#allocation13 + $0x68] sm:$0xff]  ;;  %v642_v39 = vld [vmem:[#allocation13 + $0x58] sm:$0xff]  ;;  %v641_v40 = vld [vmem:[#allocation13 + $0x50] sm:$0xff] }
  0x5d   :  { %v640_v41 = vld [vmem:[#allocation13 + $0x48] sm:$0xff]  ;;  %v639_v42 = vld [vmem:[#allocation13 + $0x40] sm:$0xff]  ;;  %v638_v43 = vld [vmem:[#allocation13 + $0x38] sm:$0xff]  ;;  %p1128_p11 = pnand %p1127_p10, %p1121_p7 }
  0x5e   :  { %v637_v44 = vld [vmem:[#allocation13 + $0x30] sm:$0xff]  ;;  %v636_v45 = vld [vmem:[#allocation13 + $0x28] sm:$0xff]  ;;  %v635_v46 = vld [vmem:[#allocation13 + $0x20] sm:$0xff] }
  0x5f   :  { %v634_v47 = vld [vmem:[#allocation13 + $0x18] sm:$0xff]  ;;  %v832_v48 = vld [vmem:[%s1358_s9] ss:$0 sm:$0xff]  ;;  %v633_v53 = vld [vmem:[#allocation13 + $0x10] sm:$0xff] }
  0x60   :  { %v632_v54 = vld [vmem:[#allocation13 + $0x8] sm:$0xff]  ;;  %v631_v55 = vld [vmem:[#allocation13] sm:$0xff] }
  0x61   :  { %v834_v56 = vld [vmem:[%s1360_s11] ss:$0 sm:$0xff] }
  0x62   :  { %v836_v61 = vld [vmem:[%s1362_s13] ss:$0 sm:$0xff] }
 0x117   :  { %v216_v5 = vpop.f32.mrf.mxu1 }
 0x118   :  { %888 = vmatmul.mubr.msk.f32.vlgmr.msra.gmra.mxu1 %vm226_vm3, %v216_v5 }
 0x119   :  { %v882_v6 = vpop.f32.mrf.mxu1  ;;  %892 = vmatprep.mubr.msk.f32.mxu1 %vm1160_vm0, %v1159_v0 }
 0x1d8   :  { %v296_v8 = vpop.f32.mrf.mxu1 }
 0x1d9   :  { %v297_v9 = vadd.f32 %v825_v7, %v296_v8 }
 0x1da   :  { %v889_v10 = vpop.f32.mrf.mxu1 }
 0x1db   :  { %v300_v11 = vmax.f32 %v297_v9, 0.0 }
 0x1dd   :  { %891 = vmatpush3.msk.msra.mxu1 %vm311_vm4, %v300_v11 }
 0x1de   :  { %893 = vmatmul.mubr.msk.f32.vlgmr.msra.gmra.mxu1 %vm307_vm5, %v301_v12  ;;  %895 = vmatprep.subr.mxu1 %v1159_v0 }
 0x1df   :  { %896 = vmatpush3.msra.mxu1 %v305_v13  ;;  %903 = vmatprep.mubr.msk.f32.mxu1 %vm1160_vm0, %v1159_v0 }
 0x1e0   :  { %897 = vmatprep.subr.mxu1 %v1159_v0 }
 0x1e1   :  { %898 = vmatpush3.msra.mxu1 %v304_v14 }
 0x1e2   :  { %899 = vmatprep.subr.mxu1 %v1159_v0 }
 0x1e3   :  { %900 = vmatpush3.msra.mxu1 %v303_v15 }
 0x1e4   :  { %901 = vmatprep.subr.mxu1 %v1159_v0 }
 0x1e5   :  { %902 = vmatpush3.msra.mxu1 %v302_v16 }
 0x1e6   :  { %911 = vmatprep.subr.mxu1 %v1159_v0 }
 0x29e   :  { %v381_v17 = vpop.f32.mrf.mxu1 }
 0x29f   :  { %904 = vmatmul.mubr.msk.f32.vlgmr.msra.gmra.mxu1 %vm391_vm6, %v381_v17 }
 0x2a0   :  { %v894_v18 = vpop.f32.mrf.mxu1  ;;  %919 = vmatprep.mubr.msk.f32.mxu1 %vm1160_vm0, %v1159_v0  ;;  %912 = vmatpush3.msra.mxu1 %v470_v19 }
 0x2a1   :  { %913 = vmatprep.subr.mxu1 %v1159_v0 }
 0x2a2   :  { %914 = vmatpush3.msra.mxu1 %v469_v20 }
 0x2a3   :  { %915 = vmatprep.subr.mxu1 %v1159_v0 }
 0x2a4   :  { %916 = vmatpush3.msra.mxu1 %v468_v21 }
 0x2a5   :  { %917 = vmatprep.subr.mxu1 %v1159_v0 }
 0x2a6   :  { %918 = vmatpush3.msra.mxu1 %v467_v28 }
 0x2a7   :  { %922 = vmatprep.subr.mxu1 %v1159_v0 }
 0x35f   :  { %v461_v23 = vpop.f32.mrf.mxu1 }
 0x360   :  { %v462_v24 = vadd.f32 %v829_v22, %v461_v23 }
 0x361   :  { %v905_v25 = vpop.f32.mrf.mxu1 }
 0x362   :  { %v465_v26 = vmax.f32 %v462_v24, 0.0 }
 0x364   :  { %907 = vmatpush3.msra.mxu0 %v465_v26 }
 0x365   :  { %909 = vmatmul.mubr.msk.f32.vlgmr.msra.gmra.mxu0 %vm472_vm7, %v466_v27  ;;  %933 = vmatprep.subr.mxu0 %v1159_v0 }
 0x366   :  { %965 = vmatprep.mubr.msk.f32.mxu0 %vm1160_vm0, %v1159_v0  ;;  %934 = vmatpush3.msra.mxu0 %v646_v35 }
 0x367   :  { %935 = vmatprep.subr.mxu0 %v1159_v0 }
 0x368   :  { %936 = vmatpush3.msra.mxu0 %v645_v36 }
 0x369   :  { %937 = vmatprep.subr.mxu0 %v1159_v0 }
 0x36a   :  { %938 = vmatpush3.msra.mxu0 %v644_v37 }
 0x36b   :  { %939 = vmatprep.subr.mxu0 %v1159_v0 }
 0x36c   :  { %940 = vmatpush3.msra.mxu0 %v643_v38 }
 0x36d   :  { %941 = vmatprep.subr.mxu0 %v1159_v0 }
 0x36e   :  { %942 = vmatpush3.msra.mxu0 %v642_v39 }
 0x36f   :  { %943 = vmatprep.subr.mxu0 %v1159_v0 }
 0x370   :  { %944 = vmatpush3.msra.mxu0 %v641_v40 }
 0x371   :  { %945 = vmatprep.subr.mxu0 %v1159_v0 }
 0x372   :  { %946 = vmatpush3.msra.mxu0 %v640_v41 }
 0x373   :  { %947 = vmatprep.subr.mxu0 %v1159_v0 }
 0x374   :  { %948 = vmatpush3.msra.mxu0 %v639_v42 }
 0x375   :  { %949 = vmatprep.subr.mxu0 %v1159_v0 }
 0x376   :  { %950 = vmatpush3.msra.mxu0 %v638_v43 }
 0x377   :  { %951 = vmatprep.subr.mxu0 %v1159_v0 }
 0x378   :  { %952 = vmatpush3.msra.mxu0 %v637_v44 }
 0x379   :  { %953 = vmatprep.subr.mxu0 %v1159_v0 }
 0x37a   :  { %954 = vmatpush3.msra.mxu0 %v636_v45 }
 0x37b   :  { %955 = vmatprep.subr.mxu0 %v1159_v0 }
 0x37c   :  { %956 = vmatpush3.msra.mxu0 %v635_v46 }
 0x37d   :  { %957 = vmatprep.subr.mxu0 %v1159_v0 }
 0x37e   :  { %958 = vmatpush3.msra.mxu0 %v634_v47 }
 0x37f   :  { %959 = vmatprep.subr.mxu0 %v1159_v0 }
 0x380   :  { %960 = vmatpush3.msra.mxu0 %v633_v53 }
 0x381   :  { %961 = vmatprep.subr.mxu0 %v1159_v0 }
 0x382   :  { %962 = vmatpush3.msra.mxu0 %v632_v54 }
 0x383   :  { %963 = vmatprep.subr.mxu0 %v1159_v0 }
 0x384   :  { %964 = vmatpush3.msra.mxu0 %v631_v55 }
 0x425   :  { %v542_v30 = vpop.f32.mrf.mxu0 }
 0x426   :  { %920 = vmatmul.mubr.msk.f32.vlgmr.msra.gmra.mxu1 %vm391_vm6, %v542_v30 }
 0x427   :  { %v910_v31 = vpop.f32.mrf.mxu0  ;;  %923 = vmatpush3.msra.mxu1 %v629_v29  ;;  %930 = vmatprep.mubr.msk.f32.mxu1 %vm1160_vm0, %v1159_v0 }
 0x428   :  { %924 = vmatprep.subr.mxu1 %v1159_v0 }
 0x429   :  { %925 = vmatpush3.msra.mxu1 %v628_v32 }
 0x42a   :  { %926 = vmatprep.subr.mxu1 %v1159_v0 }
 0x42b   :  { %927 = vmatpush3.msra.mxu1 %v627_v33 }
 0x42c   :  { %928 = vmatprep.subr.mxu1 %v1159_v0 }
 0x42d   :  { %929 = vmatpush3.msra.mxu1 %v626_v34 }
 0x4e6   :  { %v621_v49 = vpop.f32.mrf.mxu1 }
 0x4e7   :  { %v622_v50 = vadd.f32 %v832_v48, %v621_v49 }
 0x4e8   :  { %v921_v51 = vpop.f32.mrf.mxu1 }
 0x4e9   :  { %v625_v52 = vmax.f32 %v622_v50, 0.0 }
 0x4eb   :  { %931 = vmatmul.mubr.msk.f32.vlgmr.msra.gmra.mxu1 %vm391_vm6, %v625_v52 }
 0x5ab   :  { %v723_v57 = vpop.f32.mrf.mxu1 }
 0x5ac   :  { %v724_v58 = vadd.f32 %v834_v56, %v723_v57 }
 0x5ad   :  { %v932_v59 = vpop.f32.mrf.mxu1 }
 0x5ae   :  { %v727_v60 = vmax.f32 %v724_v58, 0.0 }
 0x5b0   :  { %966 = vmatmul.mubr.f32.vlgmr.msra.gmra.mxu0 %v727_v60 }
 0x670   :  { %v800_v62 = vpop.f32.mrf.mxu0 }
 0x671   :  { %v801_v63 = vadd.f32 %v836_v61, %v800_v62 }
 0x672   :  { %v967_v0 = vpop.f32.mrf.mxu0 }
 0x673   :  { %804 = vst [vmem:[#allocation14] sm:$0xff] %v801_v63 }
 0x674   :  { %1131 = shalt.err (!%p1128_p11)
}
 0x675   :  { %814 = dma.vmem_to_hbm [thread:$0]  %s812_s21, 128, %s1363_s14, [#allocation4]  }
 0x676   :  { %1148 = dma.done.wait [#allocation4], 128  }
 0x677   :  { %1149 = vsyncadd [#allocation4], 4294967168 }
 0x678   :  { %818 = vsyncpa [#allocation3], 1 }
 0x679   :  { %819 = vsyncpa [#allocation6], 1 }
 0x67a   :  { %820 = vsyncpa [#allocation9], 1 }
 0x67b   :  { %821 = vsyncpa [#allocation12], 1 }
 0x67c   :  { %822 = vsyncpa [#allocation4], 1 }

</bundles_post_ra>
